<compile_context>
chip_gen: v7x
topology: tpu7x:2x2x1
jax: 0.10.0
libtpu: 0.0.40
codegen_flags: <defaults>
</compile_context>

<pallas_src>
import jax
import jax.numpy as jnp
from jax.experimental import pallas as pl
from jax.experimental.pallas import tpu as pltpu


def _normalize_kernel(x_ref, scale_ref, bias_ref, o_ref):
    # x_ref / o_ref:        (TR, TL) VMEM tile of the flattened (N*C, H*W) view
    # scale_ref / bias_ref: (TR, 1) per-row affine params, broadcast over lanes
    x = x_ref[...].astype(jnp.float32)  # f32 compute (safe for bf16 on v5e too)
    o_ref[...] = (x * scale_ref[...] + bias_ref[...]).astype(o_ref.dtype)


def _choose_tile(dim, max_tile, multiple):
    """Largest divisor of `dim` that is <= max_tile and a multiple of
    `multiple`; falls back to the full dim (always a legal block extent)."""
    if dim <= max_tile:
        return dim
    t = (max_tile // multiple) * multiple
    while t >= multiple:
        if dim % t == 0:
            return t
        t -= multiple
    return dim


def normalize(x, mu, std, *, max_block_bytes=4 * 1024 * 1024):
    """(x - mu[:, None, None]) / std[:, None, None] for NCHW x."""
    N, C, H, W = x.shape
    assert mu.shape == (C,) and std.shape == (C,)

    R, L = N * C, H * W
    itemsize = x.dtype.itemsize

    # Fold (x - mu) / std into x * scale + bias (per-channel, computed once).
    scale_c = (1.0 / std).astype(jnp.float32)
    bias_c = (-mu / std).astype(jnp.float32)
    # One affine value per row of the flattened (N*C, H*W) view.
    scale = jnp.broadcast_to(scale_c[None, :], (N, C)).reshape(R, 1)
    bias = jnp.broadcast_to(bias_c[None, :], (N, C)).reshape(R, 1)

    x2 = x.reshape(R, L)

    # Sublane packing multiple: 8 for 32-bit, 16 for bf16, 32 for int8.
    row_mult = 8 * max(1, 4 // itemsize)

    # Lane tile: lane-dense (multiple of 128), leaving room for >= row_mult rows
    # inside the per-buffer byte budget.
    lane_cap = max(128, max_block_bytes // (row_mult * itemsize))
    TL = _choose_tile(L, lane_cap, 128)
    # Row tile: fill the remaining block budget.
    row_cap = max(1, max_block_bytes // (TL * itemsize))
    TR = _choose_tile(R, row_cap, row_mult)

    # Exact by construction (tiles divide their dims or equal them).
    grid = (pl.cdiv(R, TR), pl.cdiv(L, TL))

    out2 = pl.pallas_call(
        _normalize_kernel,
        out_shape=jax.ShapeDtypeStruct((R, L), x.dtype),
        grid=grid,
        in_specs=[
            pl.BlockSpec((TR, TL), lambda r, l: (r, l)),  # x tile
            pl.BlockSpec((TR, 1), lambda r, l: (r, 0)),   # scale (per row)
            pl.BlockSpec((TR, 1), lambda r, l: (r, 0)),   # bias  (per row)
        ],
        out_specs=pl.BlockSpec((TR, TL), lambda r, l: (r, l)),
        compiler_params=pltpu.CompilerParams(
            dimension_semantics=("parallel", "parallel"),
            # Headroom for 4 MiB blocks with double buffering; safe on
            # v5e/v6e (128 MiB physical) and within v7x's 64 MiB physical.
            vmem_limit_bytes=32 * 1024 * 1024,
        ),
    )(x2, scale, bias)

    return out2.reshape(N, C, H, W)


if __name__ == "__main__":
    key = jax.random.PRNGKey(0)
    N, C, H, W = 2, 4, 16, 16

    # Deterministic "buffers" (as registered in the PyTorch __init__).
    mu = jnp.array([0.485, 0.456, 0.406, 0.5], dtype=jnp.float32)
    std = jnp.array([0.229, 0.224, 0.225, 0.25], dtype=jnp.float32)

    x = jax.random.uniform(key, (N, C, H, W), dtype=jnp.float32)

    out = normalize(x, mu, std)
    out = jax.block_until_ready(out)

    # Reference check against plain-JAX semantics of the PyTorch forward.
    ref = (x - mu[None, :, None, None]) / std[None, :, None, None]
    assert out.shape == ref.shape
    assert jnp.allclose(out, ref, atol=1e-5, rtol=1e-5)

    print("KERNEL_OK")
</pallas_src>

<mosaic_0001>
module attributes {stable_mosaic.version = 11 : i64} {
  func.func @_normalize_kernel(%arg0: i32, %arg1: i32, %arg2: memref<8x256xf32, #tpu.memory_space<vmem>>, %arg3: memref<8x1xf32, #tpu.memory_space<vmem>>, %arg4: memref<8x1xf32, #tpu.memory_space<vmem>>, %arg5: memref<8x256xf32, #tpu.memory_space<vmem>>) attributes {dimension_semantics = [#tpu.dimension_semantics<parallel>, #tpu.dimension_semantics<parallel>], iteration_bounds = array<i64: 1, 1>, scalar_prefetch = 0 : i64, scratch_operands = 0 : i64, tpu.core_type = #tpu.core_type<tc>, window_params = [{transform_indices = @transform_0, window_bounds = array<i64: 8, 256>}, {transform_indices = @transform_1, window_bounds = array<i64: 8, 1>}, {transform_indices = @transform_2, window_bounds = array<i64: 8, 1>}, {transform_indices = @transform_3, window_bounds = array<i64: 8, 256>}]} {
    %c0 = arith.constant 0 : index
    %c0_0 = arith.constant 0 : index
    %0 = vector.load %arg2[%c0, %c0_0] : memref<8x256xf32, #tpu.memory_space<vmem>>, vector<8x256xf32>
    %c0_1 = arith.constant 0 : index
    %c0_2 = arith.constant 0 : index
    %1 = vector.load %arg3[%c0_1, %c0_2] : memref<8x1xf32, #tpu.memory_space<vmem>>, vector<8x1xf32>
    %2 = vector.broadcast %1 : vector<8x1xf32> to vector<8x256xf32>
    %3 = arith.mulf %0, %2 : vector<8x256xf32>
    %c0_3 = arith.constant 0 : index
    %c0_4 = arith.constant 0 : index
    %4 = vector.load %arg4[%c0_3, %c0_4] : memref<8x1xf32, #tpu.memory_space<vmem>>, vector<8x1xf32>
    %5 = vector.broadcast %4 : vector<8x1xf32> to vector<8x256xf32>
    %6 = arith.addf %3, %5 : vector<8x256xf32>
    %c0_5 = arith.constant 0 : index
    %c0_6 = arith.constant 0 : index
    %7 = vector.load %arg5[%c0_5, %c0_6] : memref<8x256xf32, #tpu.memory_space<vmem>>, vector<8x256xf32>
    tpu.vector_store %arg5[%c0_5, %c0_6], %6 {strides = array<i32>} : memref<8x256xf32, #tpu.memory_space<vmem>>, vector<8x256xf32>,
    return
  }
  func.func @transform_0(%arg0: i32, %arg1: i32) -> (i32, i32) {
    %c0_i32 = arith.constant 0 : i32
    return %arg0, %arg1 : i32, i32
  }
  func.func @transform_1(%arg0: i32, %arg1: i32) -> (i32, i32) {
    %c0_i32 = arith.constant 0 : i32
    %c0_i32_0 = arith.constant 0 : i32
    return %arg0, %c0_i32 : i32, i32
  }
  func.func @transform_2(%arg0: i32, %arg1: i32) -> (i32, i32) {
    %c0_i32 = arith.constant 0 : i32
    %c0_i32_0 = arith.constant 0 : i32
    return %arg0, %c0_i32 : i32, i32
  }
  func.func @transform_3(%arg0: i32, %arg1: i32) -> (i32, i32) {
    %c0_i32 = arith.constant 0 : i32
    return %arg0, %arg1 : i32, i32
  }
}

</mosaic_0001>

<bundles_post_ra>
// kernel: tpu_custom_call.1
= control target key start
LH: loop header
LB: loop body
LE: loop exit
PB: predicated region body
PF: predicated region fallthrough
CT: control target
= control target key end

     0   :  { %s122_s0 = inlined_call_operand.vmem [shape: f32[8,256], index: 0, kind: input, shape index: {}]   ;;  %s123_s1 = inlined_call_operand.vmem [shape: f32[8,1], index: 1, kind: input, shape index: {}]   ;;  %s124_s2 = inlined_call_operand.vmem [shape: f32[8,1], index: 2, kind: input, shape index: {}]   ;;  %s125_s3 = inlined_call_operand.hbm [shape: f32[8,256], index: 3, kind: output, shape index: {}]  }
   0x1   :  { %v17_v0 = vld [vmem:[%s123_s1] sm:$0xff] }
   0x2   :  { %8 = vsyncpa [#allocation3], 0  ;;  %v76_v1 = vmov 0   ;;  %v25_v2 = vld [vmem:[%s124_s2] sm:$0xff]  ;;  %v16_v5 = vld [vmem:[%s122_s0 + $0x8] sm:$0xff]  ;;  %s77_s20 = smov [#allocation2]  }
   0x3   :  { %51 = vset.pattern.permute.xlu0 %v76_v1  ;;  %v15_v4 = vld [vmem:[%s122_s0] sm:$0xff]  ;;  %s41_s1 = sshll.u32 %s77_s20, 4  ;;  %s42_s1 = int_to_ptr.vmem [resolvable:$true] %s41_s1 }
   0x4   :  { %20 = vperm.xlu0 %51, %v17_v0   ;;  %s52_s2 = scalar_lea.vmem %s42_s1, 256  ;;  %p57_p1 = scmp.lt.s32.totalorder %s42_s1, %s42_s1 }
   0x5   :  { %p53_p0 = scmp.ne.s32.totalorder %s42_s1, %s52_s2  ;;  %p58_p2 = scmp.lt.s32.totalorder %s52_s2, %s52_s2 }
   0x7   :  { %p59_p3 = por %p58_p2, %p57_p1 }
   0x8   :  { %28 = vperm.xlu0 %51, %v25_v2  }
   0x9   :  { %p60_p4 = pnand %p59_p3, %p53_p0 }
  0x83   :  { %v21_v3 = vpop.permute.xlu0 %20 }
  0x84   :  { %v23_v6 = vmul.f32 %v21_v3, %v15_v4  ;;  %v24_v7 = vmul.f32 %v21_v3, %v16_v5 }
  0x87   :  { %v29_v8 = vpop.permute.xlu0 %28 }
  0x88   :  { %v31_v9 = vadd.f32 %v29_v8, %v23_v6  ;;  %v32_v10 = vadd.f32 %v29_v8, %v24_v7 }
  0x8a   :  { %33 = vst [vmem:[#allocation2] sm:$0xff] %v31_v9  ;;  %34 = vst [vmem:[#allocation2 + $0x8] sm:$0xff] %v32_v10 }
  0x8b   :  { %63 = shalt.err (!%p60_p4)
}
  0x8c   :  { %s64_s0 = scalar_lea.hbm %s125_s3, 256 }
  0x8d   :  { %p65_p5 = scmp.ne.s32.totalorder %s125_s3, %s64_s0  ;;  %p68_p6 = scmp.lt.u32.totalorder %s64_s0, %s125_s3 }
  0x8f   :  { %p70_p7 = pnand %p68_p6, %p65_p5 }
  0x91   :  { %73 = shalt.err (!%p70_p7)
}
  0x92   :  { %44 = dma.vmem_to_hbm [thread:$0]  %s42_s1, 256, %s125_s3, [#allocation3]  }
  0x93   :  { %74 = dma.done.wait [#allocation3], 256  }
  0x94   :  { %75 = vsyncadd [#allocation3], 4294967040 }
  0x95   :  { %48 = vsyncpa [#allocation3], 1 }

</bundles_post_ra>
